<compile_context>
chip_gen: v7x
topology: tpu7x:2x2x1
jax: 0.10.0
libtpu: 0.0.40
codegen_flags: <defaults>
</compile_context>

<pallas_src>
import functools

import jax
import jax.numpy as jnp
from jax import lax
from jax.experimental import pallas as pl
from jax.experimental.pallas import tpu as pltpu


# ---------------------------------------------------------------------------
# Pallas kernel 1: fused multi-head attention core for one batch element.
#   q_ref : (1, T, E)    k_ref, v_ref : (1, S, E)    o_ref : (1, T, E)
# ---------------------------------------------------------------------------
def _mha_kernel(q_ref, k_ref, v_ref, o_ref, *, num_heads):
    E = q_ref.shape[2]
    dh = E // num_heads

    q = q_ref[0]          # (T, E) lane-dense load; q already carries 1/sqrt(dh)
    k = k_ref[0]          # (S, E)
    v = v_ref[0]          # (S, E)

    out_heads = []
    for h in range(num_heads):        # static unroll: all heads share one grid step
        lo, hi = h * dh, (h + 1) * dh
        qh = q[:, lo:hi]              # (T, dh)
        kh = k[:, lo:hi]              # (S, dh)
        vh = v[:, lo:hi]              # (S, dh)

        # content scores on the MXU: (T, S) == qh @ kh.T
        s = lax.dot_general(qh, kh,
                            dimension_numbers=(((1,), (1,)), ((), ())),
                            preferred_element_type=jnp.float32)

        # numerically-stable softmax over the src axis, all in f32
        m = jnp.max(s, axis=-1, keepdims=True)
        p = jnp.exp(s - m)
        denom = jnp.sum(p, axis=-1, keepdims=True)
        # approx=True would push the reciprocal onto the idle EUP slot, but its
        # ~2^-12 relative error exceeds the 1e-4 verification tolerance below.
        probs = p * pl.reciprocal(denom, approx=False)

        # weighted values on the MXU: (T, dh) == probs @ vh
        out_heads.append(
            lax.dot_general(probs, vh,
                            dimension_numbers=(((1,), (0,)), ((), ())),
                            preferred_element_type=jnp.float32))

    # merge heads back into a lane-dense (T, E) tile and store once (dense vst).
    o_ref[0] = jnp.concatenate(out_heads, axis=-1).astype(o_ref.dtype)


def mha_attention(q_bte, k_bse, v_bse, num_heads):
    """q:(B,T,E), k/v:(B,S,E) -> (B,T,E). q must be pre-scaled."""
    B, T, E = q_bte.shape
    S = k_bse.shape[1]
    kernel = functools.partial(_mha_kernel, num_heads=num_heads)
    return pl.pallas_call(
        kernel,
        out_shape=jax.ShapeDtypeStruct((B, T, E), q_bte.dtype),
        grid=(B,),
        in_specs=[
            pl.BlockSpec((1, T, E), lambda b: (b, 0, 0)),
            pl.BlockSpec((1, S, E), lambda b: (b, 0, 0)),
            pl.BlockSpec((1, S, E), lambda b: (b, 0, 0)),
        ],
        out_specs=pl.BlockSpec((1, T, E), lambda b: (b, 0, 0)),
        compiler_params=pltpu.CompilerParams(
            dimension_semantics=("parallel",)),
    )(q_bte, k_bse, v_bse)


# ---------------------------------------------------------------------------
# Pallas kernel 2: fused residual-add + LayerNorm over the channel axis.
#   x_ref, r_ref : (1, T, E)   g_ref, b_ref : (1, E)   o_ref : (1, T, E)
# ---------------------------------------------------------------------------
def _add_ln_kernel(x_ref, r_ref, g_ref, b_ref, o_ref, *, eps):
    x = x_ref[0].astype(jnp.float32) + r_ref[0].astype(jnp.float32)   # (T, E)
    mean = jnp.mean(x, axis=-1, keepdims=True)
    xc = x - mean
    var = jnp.mean(xc * xc, axis=-1, keepdims=True)
    inv = lax.rsqrt(var + eps)
    y = xc * inv * g_ref[...] + b_ref[...]
    o_ref[0] = y.astype(o_ref.dtype)


def add_layernorm(x_bte, res_bte, gamma, beta, eps=1e-5):
    B, T, E = x_bte.shape
    g2 = gamma.reshape(1, E)
    b2 = beta.reshape(1, E)
    kernel = functools.partial(_add_ln_kernel, eps=eps)
    return pl.pallas_call(
        kernel,
        out_shape=jax.ShapeDtypeStruct((B, T, E), x_bte.dtype),
        grid=(B,),
        in_specs=[
            pl.BlockSpec((1, T, E), lambda b: (b, 0, 0)),
            pl.BlockSpec((1, T, E), lambda b: (b, 0, 0)),
            pl.BlockSpec((1, E), lambda b: (0, 0)),
            pl.BlockSpec((1, E), lambda b: (0, 0)),
        ],
        out_specs=pl.BlockSpec((1, T, E), lambda b: (b, 0, 0)),
        compiler_params=pltpu.CompilerParams(
            dimension_semantics=("parallel",)),
    )(x_bte, res_bte, g2, b2)


# ---------------------------------------------------------------------------
# DecoderLayer forward (projections / FFN GEMMs are plain-JAX glue)
# ---------------------------------------------------------------------------
def _linear(x, w, b):
    # PyTorch nn.Linear: y = x @ W^T + b  (w is (out, in))
    return jnp.einsum("...i,oi->...o", x, w) + b


def decoder_layer_forward(x_tbe, enc_sbe, params, num_heads, eps=1e-5):
    T, B, E = x_tbe.shape
    dh = E // num_heads
    scaling = dh ** (-0.5)

    # single boundary transpose into batch-major, lane-dense (B, T, E)
    x = jnp.transpose(x_tbe, (1, 0, 2))
    enc = jnp.transpose(enc_sbe, (1, 0, 2))

    # ---- self-attention block ----
    p = params["self_attn"]
    q = _linear(x, p["q_w"] * scaling, p["q_b"] * scaling)   # scaling folded in
    k = _linear(x, p["k_w"], p["k_b"])
    v = _linear(x, p["v_w"], p["v_b"])
    attn = mha_attention(q, k, v, num_heads)
    attn = _linear(attn, p["o_w"], p["o_b"])
    x = add_layernorm(attn, x, params["self_ln_g"], params["self_ln_b"], eps)

    # ---- cross-attention (encoder-decoder) block ----
    p = params["encoder_attn"]
    q = _linear(x, p["q_w"] * scaling, p["q_b"] * scaling)
    k = _linear(enc, p["k_w"], p["k_b"])
    v = _linear(enc, p["v_w"], p["v_b"])
    attn = mha_attention(q, k, v, num_heads)
    attn = _linear(attn, p["o_w"], p["o_b"])
    x = add_layernorm(attn, x, params["enc_ln_g"], params["enc_ln_b"], eps)

    # ---- feed-forward block (dense GEMMs left to XLA/MXU) ----
    h = jax.nn.gelu(_linear(x, params["fc1_w"], params["fc1_b"]),
                    approximate=False)
    h = _linear(h, params["fc2_w"], params["fc2_b"])
    x = add_layernorm(h, x, params["final_ln_g"], params["final_ln_b"], eps)

    return jnp.transpose(x, (1, 0, 2))        # back to (T, B, E)


# ---------------------------------------------------------------------------
# Pure-JAX reference (mirrors the PyTorch forward) for verification
# ---------------------------------------------------------------------------
def _reference_attention(query_tbe, key_tbe, p, num_heads):
    T, B, E = query_tbe.shape
    S = key_tbe.shape[0]
    dh = E // num_heads
    scaling = dh ** (-0.5)
    q = _linear(query_tbe, p["q_w"], p["q_b"]) * scaling
    k = _linear(key_tbe, p["k_w"], p["k_b"])
    v = _linear(key_tbe, p["v_w"], p["v_b"])

    def shape(t, d0):   # == SelfAttention._shape
        return jnp.transpose(t.reshape(d0, B * num_heads, dh), (1, 0, 2))

    qh, kh, vh = shape(q, T), shape(k, S), shape(v, S)
    w = jnp.einsum("btd,bsd->bts", qh, kh)
    probs = jax.nn.softmax(w, axis=-1)
    out = jnp.einsum("bts,bsd->btd", probs, vh)
    out = jnp.transpose(out, (1, 0, 2)).reshape(T, B, E)
    return _linear(out, p["o_w"], p["o_b"])


def _reference_ln(x, g, b, eps=1e-5):
    mean = jnp.mean(x, axis=-1, keepdims=True)
    var = jnp.mean((x - mean) ** 2, axis=-1, keepdims=True)
    return (x - mean) / jnp.sqrt(var + eps) * g + b


def reference_decoder_layer(x, enc, params, num_heads, eps=1e-5):
    residual = x
    x = _reference_attention(x, x, params["self_attn"], num_heads)
    x = residual + x
    x = _reference_ln(x, params["self_ln_g"], params["self_ln_b"], eps)

    residual = x
    x = _reference_attention(x, enc, params["encoder_attn"], num_heads)
    x = residual + x
    x = _reference_ln(x, params["enc_ln_g"], params["enc_ln_b"], eps)

    residual = x
    x = jax.nn.gelu(_linear(x, params["fc1_w"], params["fc1_b"]),
                    approximate=False)
    x = _linear(x, params["fc2_w"], params["fc2_b"])
    x = residual + x
    x = _reference_ln(x, params["final_ln_g"], params["final_ln_b"], eps)
    return x


# ---------------------------------------------------------------------------
# Deterministic parameter init + demo
# ---------------------------------------------------------------------------
def _make_linear(key, out_dim, in_dim):
    kw, kb = jax.random.split(key)
    w = 0.05 * jax.random.normal(kw, (out_dim, in_dim), dtype=jnp.float32)
    b = 0.01 * jax.random.normal(kb, (out_dim,), dtype=jnp.float32)
    return w, b


def _make_attn_params(key, embed_dim):
    p = {}
    for k_, name in zip(jax.random.split(key, 4), ("q", "k", "v", "o")):
        p[f"{name}_w"], p[f"{name}_b"] = _make_linear(k_, embed_dim, embed_dim)
    return p


def make_params(key, embed_dim, ffn_dim):
    keys = jax.random.split(key, 7)
    params = {
        "self_attn": _make_attn_params(keys[0], embed_dim),
        "encoder_attn": _make_attn_params(keys[1], embed_dim),
    }
    for i, name in enumerate(("self_ln", "enc_ln", "final_ln")):
        kg, kb = jax.random.split(keys[2 + i])
        params[f"{name}_g"] = 1.0 + 0.05 * jax.random.normal(
            kg, (embed_dim,), dtype=jnp.float32)
        params[f"{name}_b"] = 0.01 * jax.random.normal(
            kb, (embed_dim,), dtype=jnp.float32)
    params["fc1_w"], params["fc1_b"] = _make_linear(keys[5], ffn_dim, embed_dim)
    params["fc2_w"], params["fc2_b"] = _make_linear(keys[6], embed_dim, ffn_dim)
    return params


if __name__ == "__main__":
    # seq=8 (decoder), enc_seq=16, batch=2, hidden=32, heads=4 (dh=8), ffn=128
    T, S_ENC, B, E, H, FFN = 8, 16, 2, 32, 4, 128

    key = jax.random.PRNGKey(0)
    kx, ke, kp = jax.random.split(key, 3)
    x = jax.random.normal(kx, (T, B, E), dtype=jnp.float32)
    enc = jax.random.normal(ke, (S_ENC, B, E), dtype=jnp.float32)
    params = make_params(kp, E, FFN)

    out = decoder_layer_forward(x, enc, params, num_heads=H)
    out = jax.block_until_ready(out)

    ref = reference_decoder_layer(x, enc, params, num_heads=H)
    assert out.shape == (T, B, E)
    max_err = float(jnp.max(jnp.abs(out - ref)))
    assert jnp.allclose(out, ref, atol=1e-4, rtol=1e-4), (
        f"mismatch vs reference (max abs err {max_err})")

    print("KERNEL_OK")
</pallas_src>

<mosaic_0001>
module attributes {stable_mosaic.version = 11 : i64} {
  func.func @_mha_kernel(%arg0: i32, %arg1: memref<1x8x32xf32, #tpu.memory_space<vmem>>, %arg2: memref<1x8x32xf32, #tpu.memory_space<vmem>>, %arg3: memref<1x8x32xf32, #tpu.memory_space<vmem>>, %arg4: memref<1x8x32xf32, #tpu.memory_space<vmem>>) attributes {dimension_semantics = [#tpu.dimension_semantics<parallel>], iteration_bounds = array<i64: 2>, scalar_prefetch = 0 : i64, scratch_operands = 0 : i64, tpu.core_type = #tpu.core_type<tc>, window_params = [{transform_indices = @transform_0, window_bounds = array<i64: 1, 8, 32>}, {transform_indices = @transform_1, window_bounds = array<i64: 1, 8, 32>}, {transform_indices = @transform_2, window_bounds = array<i64: 1, 8, 32>}, {transform_indices = @transform_3, window_bounds = array<i64: 1, 8, 32>}]} {
    %c0 = arith.constant 0 : index
    %c0_0 = arith.constant 0 : index
    %c0_1 = arith.constant 0 : index
    %0 = vector.load %arg1[%c0, %c0_0, %c0_1] : memref<1x8x32xf32, #tpu.memory_space<vmem>>, vector<1x8x32xf32>
    %1 = vector.shape_cast %0 : vector<1x8x32xf32> to vector<8x32xf32>
    %c0_2 = arith.constant 0 : index
    %c0_3 = arith.constant 0 : index
    %c0_4 = arith.constant 0 : index
    %2 = vector.load %arg2[%c0_2, %c0_3, %c0_4] : memref<1x8x32xf32, #tpu.memory_space<vmem>>, vector<1x8x32xf32>
    %3 = vector.shape_cast %2 : vector<1x8x32xf32> to vector<8x32xf32>
    %c0_5 = arith.constant 0 : index
    %c0_6 = arith.constant 0 : index
    %c0_7 = arith.constant 0 : index
    %4 = vector.load %arg3[%c0_5, %c0_6, %c0_7] : memref<1x8x32xf32, #tpu.memory_space<vmem>>, vector<1x8x32xf32>
    %5 = vector.shape_cast %4 : vector<1x8x32xf32> to vector<8x32xf32>
    %6 = vector.extract_strided_slice %1 {offsets = [0, 0], sizes = [8, 8], strides = [1, 1]} : vector<8x32xf32> to vector<8x8xf32>
    %7 = vector.extract_strided_slice %3 {offsets = [0, 0], sizes = [8, 8], strides = [1, 1]} : vector<8x32xf32> to vector<8x8xf32>
    %8 = vector.extract_strided_slice %5 {offsets = [0, 0], sizes = [8, 8], strides = [1, 1]} : vector<8x32xf32> to vector<8x8xf32>
    %cst = arith.constant dense<0.000000e+00> : vector<8x8xf32>
    %9 = tpu.matmul %6, %7, %cst {dimension_numbers = #tpu.dot_dimension_numbers<[1], [1], [0], [0], [0, 0, 1, 0], [], []>} : vector<8x8xf32>, vector<8x8xf32>, vector<8x8xf32> -> vector<8x8xf32>
    %cst_8 = arith.constant dense<0xFF800000> : vector<8xf32>
    %10 = vector.multi_reduction <maximumf>, %9, %cst_8 [1] : vector<8x8xf32> to vector<8xf32>
    %11 = vector.shape_cast %10 : vector<8xf32> to vector<8x1xf32>
    %12 = vector.broadcast %11 : vector<8x1xf32> to vector<8x8xf32>
    %13 = arith.subf %9, %12 : vector<8x8xf32>
    %14 = math.exp %13 : vector<8x8xf32>
    %cst_9 = arith.constant dense<0.000000e+00> : vector<8xf32>
    %15 = vector.multi_reduction <add>, %14, %cst_9 [1] : vector<8x8xf32> to vector<8xf32>
    %16 = vector.shape_cast %15 : vector<8xf32> to vector<8x1xf32>
    %17 = tpu.reciprocal %16 : vector<8x1xf32> -> vector<8x1xf32>
    %18 = vector.broadcast %17 : vector<8x1xf32> to vector<8x8xf32>
    %19 = arith.mulf %14, %18 : vector<8x8xf32>
    %cst_10 = arith.constant dense<0.000000e+00> : vector<8x8xf32>
    %20 = tpu.matmul %19, %8, %cst_10 {dimension_numbers = #tpu.dot_dimension_numbers<[1], [0], [0], [1], [0, 0, 1, 1], [], []>} : vector<8x8xf32>, vector<8x8xf32>, vector<8x8xf32> -> vector<8x8xf32>
    %21 = vector.extract_strided_slice %1 {offsets = [0, 8], sizes = [8, 8], strides = [1, 1]} : vector<8x32xf32> to vector<8x8xf32>
    %22 = vector.extract_strided_slice %3 {offsets = [0, 8], sizes = [8, 8], strides = [1, 1]} : vector<8x32xf32> to vector<8x8xf32>
    %23 = vector.extract_strided_slice %5 {offsets = [0, 8], sizes = [8, 8], strides = [1, 1]} : vector<8x32xf32> to vector<8x8xf32>
    %cst_11 = arith.constant dense<0.000000e+00> : vector<8x8xf32>
    %24 = tpu.matmul %21, %22, %cst_11 {dimension_numbers = #tpu.dot_dimension_numbers<[1], [1], [0], [0], [0, 0, 1, 0], [], []>} : vector<8x8xf32>, vector<8x8xf32>, vector<8x8xf32> -> vector<8x8xf32>
    %cst_12 = arith.constant dense<0xFF800000> : vector<8xf32>
    %25 = vector.multi_reduction <maximumf>, %24, %cst_12 [1] : vector<8x8xf32> to vector<8xf32>
    %26 = vector.shape_cast %25 : vector<8xf32> to vector<8x1xf32>
    %27 = vector.broadcast %26 : vector<8x1xf32> to vector<8x8xf32>
    %28 = arith.subf %24, %27 : vector<8x8xf32>
    %29 = math.exp %28 : vector<8x8xf32>
    %cst_13 = arith.constant dense<0.000000e+00> : vector<8xf32>
    %30 = vector.multi_reduction <add>, %29, %cst_13 [1] : vector<8x8xf32> to vector<8xf32>
    %31 = vector.shape_cast %30 : vector<8xf32> to vector<8x1xf32>
    %32 = tpu.reciprocal %31 : vector<8x1xf32> -> vector<8x1xf32>
    %33 = vector.broadcast %32 : vector<8x1xf32> to vector<8x8xf32>
    %34 = arith.mulf %29, %33 : vector<8x8xf32>
    %cst_14 = arith.constant dense<0.000000e+00> : vector<8x8xf32>
    %35 = tpu.matmul %34, %23, %cst_14 {dimension_numbers = #tpu.dot_dimension_numbers<[1], [0], [0], [1], [0, 0, 1, 1], [], []>} : vector<8x8xf32>, vector<8x8xf32>, vector<8x8xf32> -> vector<8x8xf32>
    %36 = vector.extract_strided_slice %1 {offsets = [0, 16], sizes = [8, 8], strides = [1, 1]} : vector<8x32xf32> to vector<8x8xf32>
    %37 = vector.extract_strided_slice %3 {offsets = [0, 16], sizes = [8, 8], strides = [1, 1]} : vector<8x32xf32> to vector<8x8xf32>
    %38 = vector.extract_strided_slice %5 {offsets = [0, 16], sizes = [8, 8], strides = [1, 1]} : vector<8x32xf32> to vector<8x8xf32>
    %cst_15 = arith.constant dense<0.000000e+00> : vector<8x8xf32>
    %39 = tpu.matmul %36, %37, %cst_15 {dimension_numbers = #tpu.dot_dimension_numbers<[1], [1], [0], [0], [0, 0, 1, 0], [], []>} : vector<8x8xf32>, vector<8x8xf32>, vector<8x8xf32> -> vector<8x8xf32>
    %cst_16 = arith.constant dense<0xFF800000> : vector<8xf32>
    %40 = vector.multi_reduction <maximumf>, %39, %cst_16 [1] : vector<8x8xf32> to vector<8xf32>
    %41 = vector.shape_cast %40 : vector<8xf32> to vector<8x1xf32>
    %42 = vector.broadcast %41 : vector<8x1xf32> to vector<8x8xf32>
    %43 = arith.subf %39, %42 : vector<8x8xf32>
    %44 = math.exp %43 : vector<8x8xf32>
    %cst_17 = arith.constant dense<0.000000e+00> : vector<8xf32>
    %45 = vector.multi_reduction <add>, %44, %cst_17 [1] : vector<8x8xf32> to vector<8xf32>
    %46 = vector.shape_cast %45 : vector<8xf32> to vector<8x1xf32>
    %47 = tpu.reciprocal %46 : vector<8x1xf32> -> vector<8x1xf32>
    %48 = vector.broadcast %47 : vector<8x1xf32> to vector<8x8xf32>
    %49 = arith.mulf %44, %48 : vector<8x8xf32>
    %cst_18 = arith.constant dense<0.000000e+00> : vector<8x8xf32>
    %50 = tpu.matmul %49, %38, %cst_18 {dimension_numbers = #tpu.dot_dimension_numbers<[1], [0], [0], [1], [0, 0, 1, 1], [], []>} : vector<8x8xf32>, vector<8x8xf32>, vector<8x8xf32> -> vector<8x8xf32>
    %51 = vector.extract_strided_slice %1 {offsets = [0, 24], sizes = [8, 8], strides = [1, 1]} : vector<8x32xf32> to vector<8x8xf32>
    %52 = vector.extract_strided_slice %3 {offsets = [0, 24], sizes = [8, 8], strides = [1, 1]} : vector<8x32xf32> to vector<8x8xf32>
    %53 = vector.extract_strided_slice %5 {offsets = [0, 24], sizes = [8, 8], strides = [1, 1]} : vector<8x32xf32> to vector<8x8xf32>
    %cst_19 = arith.constant dense<0.000000e+00> : vector<8x8xf32>
    %54 = tpu.matmul %51, %52, %cst_19 {dimension_numbers = #tpu.dot_dimension_numbers<[1], [1], [0], [0], [0, 0, 1, 0], [], []>} : vector<8x8xf32>, vector<8x8xf32>, vector<8x8xf32> -> vector<8x8xf32>
    %cst_20 = arith.constant dense<0xFF800000> : vector<8xf32>
    %55 = vector.multi_reduction <maximumf>, %54, %cst_20 [1] : vector<8x8xf32> to vector<8xf32>
    %56 = vector.shape_cast %55 : vector<8xf32> to vector<8x1xf32>
    %57 = vector.broadcast %56 : vector<8x1xf32> to vector<8x8xf32>
    %58 = arith.subf %54, %57 : vector<8x8xf32>
    %59 = math.exp %58 : vector<8x8xf32>
    %cst_21 = arith.constant dense<0.000000e+00> : vector<8xf32>
    %60 = vector.multi_reduction <add>, %59, %cst_21 [1] : vector<8x8xf32> to vector<8xf32>
    %61 = vector.shape_cast %60 : vector<8xf32> to vector<8x1xf32>
    %62 = tpu.reciprocal %61 : vector<8x1xf32> -> vector<8x1xf32>
    %63 = vector.broadcast %62 : vector<8x1xf32> to vector<8x8xf32>
    %64 = arith.mulf %59, %63 : vector<8x8xf32>
    %cst_22 = arith.constant dense<0.000000e+00> : vector<8x8xf32>
    %65 = tpu.matmul %64, %53, %cst_22 {dimension_numbers = #tpu.dot_dimension_numbers<[1], [0], [0], [1], [0, 0, 1, 1], [], []>} : vector<8x8xf32>, vector<8x8xf32>, vector<8x8xf32> -> vector<8x8xf32>
    %66 = tpu.concatenate %20, %35, %50, %65 in 1 : vector<8x8xf32>, vector<8x8xf32>, vector<8x8xf32>, vector<8x8xf32> -> vector<8x32xf32>
    %c0_23 = arith.constant 0 : index
    %c0_24 = arith.constant 0 : index
    %c0_25 = arith.constant 0 : index
    %67 = vector.load %arg4[%c0_23, %c0_24, %c0_25] : memref<1x8x32xf32, #tpu.memory_space<vmem>>, vector<1x8x32xf32>
    %68 = vector.shape_cast %67 : vector<1x8x32xf32> to vector<8x32xf32>
    %69 = vector.shape_cast %66 : vector<8x32xf32> to vector<1x8x32xf32>
    tpu.vector_store %arg4[%c0_23, %c0_24, %c0_25], %69 {strides = array<i32>} : memref<1x8x32xf32, #tpu.memory_space<vmem>>, vector<1x8x32xf32>,
    return
  }
  func.func @transform_0(%arg0: i32) -> (i32, i32, i32) {
    %c0_i32 = arith.constant 0 : i32
    %c0_i32_0 = arith.constant 0 : i32
    %c0_i32_1 = arith.constant 0 : i32
    return %arg0, %c0_i32, %c0_i32_0 : i32, i32, i32
  }
  func.func @transform_1(%arg0: i32) -> (i32, i32, i32) {
    %c0_i32 = arith.constant 0 : i32
    %c0_i32_0 = arith.constant 0 : i32
    %c0_i32_1 = arith.constant 0 : i32
    return %arg0, %c0_i32, %c0_i32_0 : i32, i32, i32
  }
  func.func @transform_2(%arg0: i32) -> (i32, i32, i32) {
    %c0_i32 = arith.constant 0 : i32
    %c0_i32_0 = arith.constant 0 : i32
    %c0_i32_1 = arith.constant 0 : i32
    return %arg0, %c0_i32, %c0_i32_0 : i32, i32, i32
  }
  func.func @transform_3(%arg0: i32) -> (i32, i32, i32) {
    %c0_i32 = arith.constant 0 : i32
    %c0_i32_0 = arith.constant 0 : i32
    %c0_i32_1 = arith.constant 0 : i32
    return %arg0, %c0_i32, %c0_i32_0 : i32, i32, i32
  }
}

</mosaic_0001>

<bundles_post_ra>
// kernel: tpu_custom_call.1
= control target key start
LH: loop header
LB: loop body
LE: loop exit
PB: predicated region body
PF: predicated region fallthrough
CT: control target
= control target key end

     0   :  { %s1715_s0 = inlined_call_operand.hbm [shape: f32[2,8,32], index: 0, kind: input, shape index: {}]   ;;  %s1716_s1 = inlined_call_operand.hbm [shape: f32[2,8,32], index: 1, kind: input, shape index: {}]   ;;  %s1717_s2 = inlined_call_operand.hbm [shape: f32[2,8,32], index: 2, kind: input, shape index: {}]   ;;  %s1718_s3 = inlined_call_operand.hbm [shape: f32[2,8,32], index: 3, kind: output, shape index: {}]  }
   0x1   :  { %1723 = sst [smem:[#allocation12_spill]] %s1716_s1 }
   0x2   :  { %8 = vsyncpa [#allocation3], 0 }
   0x3   :  { %10 = vsyncpa [#allocation3 + $0x1], 0 }
   0x4   :  { %11 = vsyncpa [#allocation6], 0 }
   0x5   :  { %13 = vsyncpa [#allocation6 + $0x1], 0 }
   0x6   :  { %14 = vsyncpa [#allocation4], 0 }
   0x7   :  { %16 = vsyncpa [#allocation4 + $0x1], 0  ;;  %s1423_s12 = smov 0   ;;  %s1425_s13 = smov 0  }
   0x8   :  { %s1427_s14 = smov 0   ;;  %s1429_s15 = smov 0  }
   0x9 LB: > { %s1444_s16 = sadd.s32 4294967295, %s1389_s15   ;;  %s1063_s17 = sadd.s32 4294967294, %s1389_s15   ;;  %s1389_s15 = sphi %s1429_s15, %s1742_s15   ;;  %s1385_s14 = sphi %s1427_s14, %s1741_s14   ;;  %s1381_s13 = sphi %s1425_s13, %s1740_s13   ;;  %s1377_s12 = sphi %s1423_s12, %s1739_s12  }
   0xa   : > { %s1448_s18 = sadd.s32 1, %s1389_s15   ;;  %s29_s19 = sadd.s32 1, %s1385_s14 }
   0xb   : > { %s26_s20 = ssub.s32 %s1389_s15, %s1448_s18  ;;  %p36_p0 = scmp.ne.s32.totalorder %s1385_s14, %s1381_s13 }
   0xc   : > { %p27_p1 = scmp.eq.s32.totalorder %s26_s20, 0  ;;  %p37_p2 = scmp.eq.s32.totalorder %s1389_s15, 0 }
   0xd   : > { %p42_p3 = scmp.ne.s32.totalorder %s1381_s13, %s1377_s12  ;;  %p43_p4 = scmp.eq.s32.totalorder %s1444_s16, 0 }
   0xe   : > { %s1460_s21 = scalar_select %p27_p1, %s1385_s14, %s29_s19  }
   0xf   : > { %p38_p5 = por %p37_p2, %p36_p0  ;;  %p1462_p6 = por %p43_p4, %p42_p3 }
  0x10   : > { %p118_p7 = scmp.eq.s32.totalorder %s1444_s16, 1  ;;  %p124_p8 = scmp.eq.s32.totalorder %s1063_s17, 1 }
  0x11   : > { %s1724_s22 = scalar_select %p1462_p6, 1, 0 }
  0x12   : > { %p1171_p10 = scmp.lt.s32.totalorder %s1389_s15, 2  ;;  %p1469_p11 = por %p118_p7, %p36_p0 }
  0x13   : > { %p1473_p12 = por %p124_p8, %p42_p3  ;;  %s144_s25 = sand.u32 1, %s1385_s14  }
  0x14   : > { %s1725_s23 = scalar_select %p1469_p11, 1, 0 }
  0x15   : > { %s1726_s24 = scalar_select %p1473_p12, 1, 0 }
  0x16   : > { %s1479_s26 = sshll.u32 %s1389_s15, 7  ;;  %s1483_s27 = sshll.u32 %s144_s25, 3 }
  0x17   : > { %p1485_p13 = pnand %p1171_p10, %p38_p5  ;;  %s162_s29 = sand.u32 1, %s1389_s15  }
  0x18   : > { %s1728_s1 = sld [smem:[#allocation12_spill]]  ;;  %s166_s6 = scalar_lea.vmem [#allocation5], %s1483_s27 }
  0x19   : > { %s1727_s28 = scalar_select %p1485_p13, 1, 0 }
  0x1a   : > { %s173_s7 = sshll.u32 %s166_s6, 4  ;;  %s1500_s8 = scalar_lea.sflag [#allocation6], %s162_s29  ;;  %s1497_s7 = int_to_ptr.vmem [resolvable:$true] %s173_s7 }
  0x1b   : > { %p1506_p2 = pneg %p1485_p13 }
  0x1e   : > { %s1494_s5 = scalar_lea.hbm %s1728_s1, %s1479_s26  ;;  %s1234_s19 = scalar_lea.hbm %s1728_s1, 256 }
  0x1f   : > { %s1229_s9 = scalar_lea.hbm %s1494_s5, 128  ;;  %p1235_p5 = scmp.lt.u32.totalorder %s1494_s5, %s1728_s1 }
  0x20   : > { %p1230_p1 = scmp.ne.s32.totalorder %s1494_s5, %s1229_s9  ;;  %p1236_p7 = scmp.lt.u32.totalorder %s1234_s19, %s1229_s9 }
  0x21   : > { %p1238_p10 = scmp.lt.u32.totalorder %s1229_s9, %s1494_s5 }
  0x22   : > { %p1232_p3 = pnand %p1506_p2, %p1230_p1  ;;  %p1237_p8 = por %p1236_p7, %p1235_p5 }
  0x24   : > { %p1233_p4 = pneg %p1232_p3  ;;  %p1239_p9 = por %p1238_p10, %p1237_p8 }
  0x26   : > { %p1240_p0 = pnand %p1239_p9, %p1233_p4 }
  0x28   : > { %1243 = shalt.err (!%p1240_p0)
}
  0x29   : > { %s1244_s29 = scalar_lea.vmem %s1497_s7, 128  ;;  %s1391_s4 = smov [#allocation5]  }
  0x2a   : > { %p1245_p1 = scmp.ne.s32.totalorder %s1497_s7, %s1244_s29  ;;  %s1249_s6 = sshll.u32 %s1391_s4, 4  ;;  %s1250_s6 = int_to_ptr.vmem [resolvable:$false] %s1249_s6 }
  0x2b   : > { %s1251_s11 = scalar_lea.vmem %s1250_s6, 256  ;;  %p1252_p11 = scmp.lt.s32.totalorder %s1497_s7, %s1250_s6 }
  0x2c   : > { %p1247_p3 = pnand %p1245_p1, %p1506_p2  ;;  %p1253_p6 = scmp.lt.s32.totalorder %s1251_s11, %s1244_s29 }
  0x2e   : > { %p1248_p12 = pneg %p1247_p3  ;;  %p1254_p5 = por %p1253_p6, %p1252_p11 }
  0x30   : > { %p1255_p7 = pnand %p1254_p5, %p1248_p12 }
  0x32   : > { %1258 = shalt.err (!%p1255_p7)
}
  0x33   : > { %1163 = dma.hbm_to_vmem [thread:$0]  (!%p1485_p13), %s1494_s5, 128, %s1497_s7, %s1500_s8  }
  0x34   : > { %p196_p9 = scmp.lt.s32.totalorder %s1389_s15, 3  ;;  %s1535_s19 = scalar_lea.hbm %s1715_s0, %s1479_s26 }
  0x35   : > { %p1730_p6 = scmp.ge.s32.totalorder %s1389_s15, 1  ;;  %s148_s30 = scalar_lea.vmem [#allocation2], %s1483_s27 }
  0x36   : > { %s155_s29 = sshll.u32 %s148_s30, 4  ;;  %s145_s5 = scalar_lea.sflag [#allocation3], %s144_s25  ;;  %s156_s29 = int_to_ptr.vmem [resolvable:$true] %s155_s29 }
  0x37   : > { %p1539_p11 = pnand %p1730_p6, %p196_p9  ;;  %s1259_s7 = scalar_lea.hbm %s1535_s19, 128 }
  0x38   : > { %p1260_p12 = scmp.ne.s32.totalorder %s1535_s19, %s1259_s7  ;;  %s1264_s11 = scalar_lea.hbm %s1715_s0, 256 }
  0x39   : > { %s1731_s20 = scalar_select %p1539_p11, 1, 0 }
  0x3a   : > { %p1262_p0 = pnand %p1260_p12, %p1506_p2  ;;  %p1265_p8 = scmp.lt.u32.totalorder %s1535_s19, %s1715_s0 }
  0x3b   : > { %p1266_p10 = scmp.lt.u32.totalorder %s1264_s11, %s1259_s7  ;;  %p1268_p3 = scmp.lt.u32.totalorder %s1259_s7, %s1535_s19 }
  0x3c   : > { %p1263_p4 = pneg %p1262_p0 }
  0x3d   : > { %p1267_p1 = por %p1266_p10, %p1265_p8 }
  0x3f   : > { %p1269_p5 = por %p1268_p3, %p1267_p1 }
  0x41   : > { %p1270_p7 = pnand %p1269_p5, %p1263_p4 }
  0x43   : > { %1273 = shalt.err (!%p1270_p7)
}
  0x44   : > { %s1274_s25 = scalar_lea.vmem %s156_s29, 128  ;;  %s1392_s30 = smov [#allocation2]  }
  0x45   : > { %p1275_p9 = scmp.ne.s32.totalorder %s156_s29, %s1274_s25  ;;  %s1279_s1 = sshll.u32 %s1392_s30, 4  ;;  %s1280_s1 = int_to_ptr.vmem [resolvable:$false] %s1279_s1 }
  0x46   : > { %s1281_s4 = scalar_lea.vmem %s1280_s1, 256  ;;  %p1282_p0 = scmp.lt.s32.totalorder %s156_s29, %s1280_s1 }
  0x47   : > { %p1277_p6 = pnand %p1275_p9, %p1506_p2  ;;  %p1283_p11 = scmp.lt.s32.totalorder %s1281_s4, %s1274_s25 }
  0x49   : > { %p1278_p12 = pneg %p1277_p6  ;;  %p1284_p13 = por %p1283_p11, %p1282_p0 }
  0x4b   : > { %p1285_p8 = pnand %p1284_p13, %p1278_p12 }
  0x4d   : > { %1288 = shalt.err (!%p1285_p8)
}
  0x4e   : > { %p1732_p10 = scmp.ne.s32.totalorder %s1727_s28, 0  ;;  %s1567_s11 = scalar_lea.hbm %s1717_s2, %s1479_s26 }
  0x4f   : > { %s184_s1 = scalar_lea.vmem [#allocation7], %s1483_s27  ;;  %s1289_s17 = scalar_lea.hbm %s1567_s11, 128 }
  0x50   : > { %1160 = dma.hbm_to_vmem [thread:$0]  (!%p1732_p10), %s1535_s19, 128, %s156_s29, %s145_s5  }
  0x51   : > { %s191_s9 = sshll.u32 %s184_s1, 4  ;;  %p1290_p13 = scmp.ne.s32.totalorder %s1567_s11, %s1289_s17  ;;  %s192_s9 = int_to_ptr.vmem [resolvable:$true] %s191_s9 }
  0x52   : > { %s1294_s19 = scalar_lea.hbm %s1717_s2, 256  ;;  %p1295_p1 = scmp.lt.u32.totalorder %s1567_s11, %s1717_s2 }
  0x53   : > { %p1292_p11 = pnand %p1290_p13, %p1506_p2  ;;  %p1296_p3 = scmp.lt.u32.totalorder %s1294_s19, %s1289_s17 }
  0x54   : > { %p1298_p7 = scmp.lt.u32.totalorder %s1289_s17, %s1567_s11 }
  0x55   : > { %p1293_p4 = pneg %p1292_p11  ;;  %p1297_p5 = por %p1296_p3, %p1295_p1 }
  0x57   : > { %p1299_p9 = por %p1298_p7, %p1297_p5 }
  0x59   : > { %p1300_p6 = pnand %p1299_p9, %p1293_p4 }
  0x5b   : > { %1303 = shalt.err (!%p1300_p6)
}
  0x5c   : > { %s1304_s26 = scalar_lea.vmem %s192_s9, 128  ;;  %s1393_s27 = smov [#allocation7]  }
  0x5d   : > { %p1305_p12 = scmp.ne.s32.totalorder %s192_s9, %s1304_s26  ;;  %s1309_s4 = sshll.u32 %s1393_s27, 4  ;;  %s1310_s4 = int_to_ptr.vmem [resolvable:$false] %s1309_s4 }
  0x5e   : > { %s1311_s7 = scalar_lea.vmem %s1310_s4, 256  ;;  %p1312_p13 = scmp.lt.s32.totalorder %s192_s9, %s1310_s4 }
  0x5f   : > { %p1307_p0 = pnand %p1305_p12, %p1506_p2  ;;  %p1313_p11 = scmp.lt.s32.totalorder %s1311_s7, %s1304_s26 }
  0x61   : > { %p1308_p8 = pneg %p1307_p0  ;;  %p1314_p10 = por %p1313_p11, %p1312_p13 }
  0x63   : > { %p1315_p1 = pnand %p1314_p10, %p1308_p8 }
  0x65   : > { %1318 = shalt.err (!%p1315_p1)
}
  0x66   : > { %p1733_p3 = scmp.ne.s32.totalorder %s1727_s28, 0  ;;  %p1734_p4 = scmp.ne.s32.totalorder %s1731_s20, 0 }
  0x67   : > { %s1591_s10 = sand.u32 (!%p1734_p4), 1, %s1381_s13   ;;  %p1735_p2 = scmp.ne.s32.totalorder (!%p1734_p4), %s1724_s22, 0 }
  0x68   : > { %1166 = dma.hbm_to_vmem [thread:$0]  (!%p1733_p3), %s1567_s11, 128, %s192_s9, %s1500_s8  }
  0x69   : > { %200 = sbr.rel (%p1734_p4) target bundleno = 1573 (0x625), region = 32  ;;  %s1594_s6 = sshll.u32 (!%p1734_p4), %s1591_s10, 3 }
  0x6a   : > { %s203_s1 = scalar_lea.sflag (!%p1734_p4), [#allocation3], %s1591_s10  ;;  %s206_s17 = scalar_lea.vmem (!%p1734_p4), [#allocation2], %s1594_s6 }
  0x70   : > { %1364 = dma.done.wait (%p1735_p2), %s203_s1, 128  }
  0x71   : > { %1366 = vsyncadd (%p1735_p2), %s203_s1, 4294967168  ;;  %s211_s28 = sand.u32 1, %s1444_s16   ;;  %s215_s20 = scalar_lea.vmem [#allocation5], %s1594_s6 }
  0x72   : > { %s212_s8 = scalar_lea.sflag [#allocation6], %s211_s28 }
  0x73   : > { %1368 = dma.done.wait (%p1735_p2), %s212_s8, 256  }
  0x74   : > { %1370 = vsyncadd (%p1735_p2), %s212_s8, 4294967040  ;;  %v1394_v0 = vmov 0.0   ;;  %vm1395_vm0 = vmmov 0   ;;  %vm260_vm1 = vcmask 64512   ;;  %v258_v1 = vld [vmem:[%s215_s20] sm:$0xff]  ;;  %v257_v2 = vld [vmem:[%s206_s17] sm:$0xff] }
  0x75   : > { %1109 = vmatprep.subr.mxu0 %v1394_v0  ;;  %1111 = vmatprep.mubr.msk.f32.mxu0 %vm1395_vm0, %v1394_v0  ;;  %s1396_s22 = smov 120   ;;  %s1397_s11 = smov 112   ;;  %vm930_vm2 = vcmask 130048   ;;  %vm932_vm3 = vcmask 195584   ;;  %vm934_vm4 = vcmask 261120  }
  0x76   : > { %1114 = vmatprep.subr.mxu1 %v1394_v0  ;;  %1116 = vmatprep.mubr.msk.f32.mxu1 %vm1395_vm0, %v1394_v0  ;;  %s1398_s9 = smov 104   ;;  %s224_s25 = scalar_lea.vmem [#allocation7], %s1594_s6 }
  0x77   : > { %1110 = vmatpush3.xpose.msk.msra.mxu0 %vm260_vm1, %v258_v1  ;;  %423 = vrot.lane.b32.xlu1 %v258_v1, %s1396_s22  ;;  %v259_v11 = vld [vmem:[%s224_s25] sm:$0xff]  ;;  %s1399_s30 = smov 8   ;;  %s1400_s19 = smov 16  }
  0x78   : > { %1124 = vmatprep.subr.mxu0 %v1394_v0  ;;  %1115 = vmatpush3.msra.mxu1 %v259_v11  ;;  %s1401_s29 = smov 24   ;;  %s1090_s5 = sshll.u32 %s1444_s16, 7 }
  0x79   : > { %1119 = vmatprep.subr.mxu1 %v1394_v0  ;;  %s256_s26 = scalar_lea.vmem [#allocation8], %s1594_s6  ;;  %s1671_s1 = scalar_lea.hbm %s1718_s3, %s1090_s5 }
  0x7a   : > { %1112 = vmatmul.mubr.msk.f32.vlgmr.msra.gmra.mrb[0].mxu0 %vm260_vm1, %v257_v2  ;;  %s950_s27 = sshll.u32 %s256_s26, 4  ;;  %s937_s16 = scalar_lea.sflag [#allocation4], %s1591_s10  ;;  %s1673_s27 = int_to_ptr.vmem [resolvable:$true] %s950_s27 }
  0x7b   : > { %1126 = vmatprep.mubr.msk.f32.mxu0 %vm1395_vm0, %v1394_v0  ;;  %421 = vrot.lane.b32.xlu1 %v257_v2, %s1396_s22  ;;  %s1319_s6 = scalar_lea.vmem %s1673_s27, 128  ;;  %p1736_p5 = scmp.ne.s32.totalorder %s1725_s23, 0 }
  0x7c   : > { %p1320_p10 = scmp.ne.s32.totalorder %s1673_s27, %s1319_s6  ;;  %s1402_s17 = smov [#allocation8]  }
  0x7d   : > { %s1323_s28 = sshll.u32 %s1402_s17, 4  ;;  %s1324_s28 = int_to_ptr.vmem [resolvable:$false] %s1323_s28 }
  0x7e   : > { %p1321_p7 = pnand %p1320_p10, %p1736_p5  ;;  %s1325_s8 = scalar_lea.vmem %s1324_s28, 256 }
  0x7f   : > { %587 = vrot.lane.b32.xlu1 %v257_v2, %s1397_s11  ;;  %p1326_p6 = scmp.lt.s32.totalorder %s1673_s27, %s1324_s28  ;;  %p1327_p12 = scmp.lt.s32.totalorder %s1325_s8, %s1319_s6 }
  0x80   : > { %p1322_p9 = pneg %p1321_p7 }
  0x81   : > { %p1328_p0 = por %p1327_p12, %p1326_p6 }
  0x83   : > { %754 = vrot.lane.b32.xlu1 %v258_v1, %s1398_s9  ;;  %p1329_p8 = pnand %p1328_p0, %p1322_p9 }
  0x87   : > { %752 = vrot.lane.b32.xlu1 %v257_v2, %s1398_s9 }
  0xe9   : > { %v424_v12 = vpop.permute.xlu1 %423 }
  0xed   : > { %v422_v14 = vpop.permute.xlu1 %421 }
  0xf1   : > { %v588_v16 = vpop.permute.xlu1 %587 }
  0xf5   : > { %v755_v19 = vpop.permute.xlu1 %754 }
  0xf9   : > { %v753_v20 = vpop.permute.xlu1 %752 }
 0x14d   : > { %v333_v3 = vpop.f32.mrb[0].mxu0 }
 0x14e   : > { %v1113_v4 = vpop.f32.mrb[1].mxu0  ;;  %v337_v5 = vsel %vm260_vm1, %v333_v3, -inf }
 0x14f   : > { %338 = vmax.xlane.f32.xlu0 %v337_v5 }
 0x1dc   : > { %v339_v6 = vpop.xlane.xlu0 %338 }
 0x1dd   : > { %v340_v7 = vsub.f32 %v333_v3, %v339_v6 }
 0x1df   : > { %v341_v8 = vmul.f32 1.442695, %v340_v7 }
 0x1e1   : > { %1213 = vpow2.f32 %v341_v8 }
 0x1eb   : > { %v1214_v9 = vpop.eup %1213 }
 0x1ec   : > { %v343_v10 = vsel %vm260_vm1, %v1214_v9, 0.0 }
 0x1ed   : > { %344 = vadd.xlane.f32.xlu0 %v343_v10 }
 0x203   : > { %589 = vrot.lane.b32.xlu0 %v258_v1, %s1397_s11 }
 0x27a   : > { %v345_v13 = vpop.xlane.xlu0 %344 }
 0x27b   : > { %1215 = vrcp.f32 %v345_v13 }
 0x27e   : > { %v590_v18 = vpop.permute.xlu0 %589 }
 0x285   : > { %v1216_v15 = vpop.eup %1215 }
 0x286   : > { %v347_v17 = vmul.f32 %v1216_v15, %v1214_v9 }
 0x288   : > { %1117 = vmatmul.mubr.msk.f32.vlgmr.msra.gmra.mrb[0].mxu1 %vm260_vm1, %v347_v17 }
 0x289   : > { %1120 = vmatpush3.xpose.msk.msra.mxu1 %vm260_vm1, %v424_v12  ;;  %1121 = vmatprep.mubr.msk.f32.mxu1 %vm1395_vm0, %v1394_v0 }
 0x28a   : > { %1129 = vmatprep.subr.mxu1 %v1394_v0 }
 0x28c   : > { %1122 = vmatmul.mubr.msk.f32.vlgmr.msra.gmra.mrb[2].mxu1 %vm260_vm1, %v422_v14 }
 0x28d   : > { %1130 = vmatpush3.xpose.msk.msra.mxu1 %vm260_vm1, %v590_v18  ;;  %1131 = vmatprep.mubr.msk.f32.mxu1 %vm1395_vm0, %v1394_v0 }
 0x28e   : > { %1139 = vmatprep.subr.mxu1 %v1394_v0 }
 0x290   : > { %1132 = vmatmul.mubr.msk.f32.vlgmr.msra.gmra.mrb[4].mxu1 %vm260_vm1, %v588_v16 }
 0x291   : > { %1140 = vmatpush3.xpose.msk.msra.mxu1 %vm260_vm1, %v755_v19  ;;  %1141 = vmatprep.mubr.msk.f32.mxu1 %vm1395_vm0, %v1394_v0 }
 0x294   : > { %1142 = vmatmul.mubr.msk.f32.vlgmr.msra.gmra.mrb[6].mxu1 %vm260_vm1, %v753_v20 }
 0x35b   : > { %v1644_v21 = vpop.f32.mrb[0].mxu1 }
 0x35c   : > { %v1118_v22 = vpop.f32.mrb[1].mxu1 }
 0x35f   : > { %v495_v23 = vpop.f32.mrb[2].mxu1 }
 0x360   : > { %v1123_v24 = vpop.f32.mrb[3].mxu1  ;;  %v499_v25 = vsel %vm260_vm1, %v495_v23, -inf }
 0x361   : > { %500 = vmax.xlane.f32.xlu1 %v499_v25 }
 0x363   : > { %v661_v26 = vpop.f32.mrb[4].mxu1 }
 0x364   : > { %v665_v27 = vsel %vm260_vm1, %v661_v26, -inf  ;;  %v1133_v28 = vpop.f32.mrb[5].mxu1 }
 0x365   : > { %666 = vmax.xlane.f32.xlu0 %v665_v27 }
 0x367   : > { %v826_v29 = vpop.f32.mrb[6].mxu1 }
 0x368   : > { %v830_v30 = vsel %vm260_vm1, %v826_v29, -inf  ;;  %v1143_v31 = vpop.f32.mrb[7].mxu1 }
 0x369   : > { %831 = vmax.xlane.f32.xlu1 %v830_v30 }
 0x3ee   : > { %v501_v32 = vpop.xlane.xlu1 %500 }
 0x3ef   : > { %v502_v33 = vsub.f32 %v495_v23, %v501_v32 }
 0x3f1   : > { %v503_v34 = vmul.f32 1.442695, %v502_v33 }
 0x3f2   : > { %v667_v35 = vpop.xlane.xlu0 %666 }
 0x3f3   : > { %1217 = vpow2.f32 %v503_v34  ;;  %v668_v36 = vsub.f32 %v661_v26, %v667_v35 }
 0x3f5   : > { %v669_v37 = vmul.f32 1.442695, %v668_v36 }
 0x3f6   : > { %v832_v42 = vpop.xlane.xlu1 %831 }
 0x3f7   : > { %1219 = vpow2.f32 %v669_v37  ;;  %v833_v43 = vsub.f32 %v826_v29, %v832_v42 }
 0x3f9   : > { %v834_v44 = vmul.f32 1.442695, %v833_v43 }
 0x3fb   : > { %1221 = vpow2.f32 %v834_v44 }
 0x3fd   : > { %v1218_v38 = vpop.eup %1217 }
 0x3fe   : > { %v505_v39 = vsel %vm260_vm1, %v1218_v38, 0.0 }
 0x3ff   : > { %506 = vadd.xlane.f32.xlu1 %v505_v39 }
 0x401   : > { %v1220_v40 = vpop.eup %1219 }
 0x402   : > { %v671_v41 = vsel %vm260_vm1, %v1220_v40, 0.0 }
 0x403   : > { %672 = vadd.xlane.f32.xlu0 %v671_v41 }
 0x405   : > { %v1222_v45 = vpop.eup %1221 }
 0x406   : > { %v836_v46 = vsel %vm260_vm1, %v1222_v45, 0.0 }
 0x410   : > { %676 = vrot.lane.b32.xlu1 %v259_v11, %s1397_s11 }
 0x419   : > { %511 = vrot.lane.b32.xlu0 %v259_v11, %s1396_s22 }
 0x434   : > { %837 = vadd.xlane.f32.xlu1 %v836_v46 }
 0x445   : > { %841 = vrot.lane.b32.xlu1 %v259_v11, %s1398_s9 }
 0x48c   : > { %v507_v47 = vpop.xlane.xlu1 %506 }
 0x48d   : > { %1223 = vrcp.f32 %v507_v47 }
 0x490   : > { %v673_v48 = vpop.xlane.xlu0 %672  ;;  %v677_v52 = vpop.permute.xlu1 %676 }
 0x491   : > { %1225 = vrcp.f32 %v673_v48 }
 0x494   : > { %v512_v49 = vpop.permute.xlu0 %511 }
 0x495   : > { %1125 = vmatpush3.msra.mxu0 %v512_v49 }
 0x496   : > { %1134 = vmatprep.subr.mxu0 %v1394_v0 }
 0x497   : > { %v1224_v50 = vpop.eup %1223 }
 0x498   : > { %v509_v51 = vmul.f32 %v1224_v50, %v1218_v38 }
 0x49a   : > { %1127 = vmatmul.mubr.msk.f32.vlgmr.msra.gmra.mrb[2].mxu0 %vm260_vm1, %v509_v51 }
 0x49b   : > { %v1226_v53 = vpop.eup %1225  ;;  %1135 = vmatpush3.msra.mxu0 %v677_v52  ;;  %1136 = vmatprep.mubr.msk.f32.mxu0 %vm1395_vm0, %v1394_v0 }
 0x49c   : > { %v675_v54 = vmul.f32 %v1226_v53, %v1220_v40  ;;  %1144 = vmatprep.subr.mxu0 %v1394_v0 }
 0x49e   : > { %1137 = vmatmul.mubr.msk.f32.vlgmr.msra.gmra.mrb[4].mxu0 %vm260_vm1, %v675_v54 }
 0x49f   : > { %1146 = vmatprep.mubr.msk.f32.mxu0 %vm1395_vm0, %v1394_v0 }
 0x4c1   : > { %v838_v55 = vpop.xlane.xlu1 %837 }
 0x4c2   : > { %1227 = vrcp.f32 %v838_v55 }
 0x4c5   : > { %v842_v56 = vpop.permute.xlu1 %841 }
 0x4c6   : > { %1145 = vmatpush3.msra.mxu0 %v842_v56 }
 0x4cc   : > { %v1228_v57 = vpop.eup %1227 }
 0x4cd   : > { %v840_v58 = vmul.f32 %v1228_v57, %v1222_v45 }
 0x4cf   : > { %1147 = vmatmul.mubr.msk.f32.vlgmr.msra.gmra.mrb[6].mxu0 %vm260_vm1, %v840_v58 }
 0x56d   : > { %v583_v59 = vpop.f32.mrb[2].mxu0 }
 0x56e   : > { %918 = vrot.lane.b32.xlu0 %v583_v59, %s1399_s30  ;;  %v1128_v60 = vpop.f32.mrb[3].mxu0 }
 0x571   : > { %v748_v61 = vpop.f32.mrb[4].mxu0 }
 0x572   : > { %922 = vrot.lane.b32.xlu1 %v748_v61, %s1400_s19  ;;  %v1138_v62 = vpop.f32.mrb[5].mxu0 }
 0x5a2   : > { %v913_v63 = vpop.f32.mrb[6].mxu0 }
 0x5a3   : > { %926 = vrot.lane.b32.xlu0 %v913_v63, %s1401_s29  ;;  %v1148_v0 = vpop.f32.mrb[7].mxu0 }
 0x5e0   : > { %v919_v1 = vpop.permute.xlu0 %918 }
 0x5e1   : > { %v929_v3 = vsel %vm260_vm1, %v1644_v21, %v919_v1 }
 0x5e4   : > { %v923_v2 = vpop.permute.xlu1 %922 }
 0x5e5   : > { %v931_v4 = vsel %vm930_vm2, %v929_v3, %v923_v2 }
 0x615   : > { %v927_v5 = vpop.permute.xlu0 %926 }
 0x616   : > { %v933_v6 = vsel %vm932_vm3, %v931_v4, %v927_v5 }
 0x617   : > { %935 = vst.msk [vmem:[%s256_s26] sm:$0xff] %vm934_vm4, %v933_v6 }
 0x618   : > { %1332 = shalt.err (!%p1329_p8)
}
 0x619   : > { %s1333_s10 = scalar_lea.hbm %s1671_s1, 128  ;;  %s1337_s11 = scalar_lea.hbm %s1718_s3, 256 }
 0x61a   : > { %p1334_p13 = scmp.ne.s32.totalorder %s1671_s1, %s1333_s10  ;;  %p1338_p3 = scmp.lt.u32.totalorder %s1671_s1, %s1718_s3 }
 0x61b   : > { %p1339_p4 = scmp.lt.u32.totalorder %s1337_s11, %s1333_s10  ;;  %p1341_p10 = scmp.lt.u32.totalorder %s1333_s10, %s1671_s1 }
 0x61c   : > { %p1335_p11 = pnand %p1334_p13, %p1736_p5 }
 0x61d   : > { %p1340_p2 = por %p1339_p4, %p1338_p3 }
 0x61e   : > { %p1336_p1 = pneg %p1335_p11 }
 0x61f   : > { %p1342_p7 = por %p1341_p10, %p1340_p2 }
 0x621   : > { %p1343_p9 = pnand %p1342_p7, %p1336_p1 }
 0x623   : > { %1346 = shalt.err (!%p1343_p9)
}
 0x624   : > { %1155 = dma.vmem_to_hbm [thread:$0]  (%p1736_p5), %s1673_s27, 128, %s1671_s1, %s937_s16  }
 0x625 PF: > { %s962_s30 = sand.u32 1, %s1377_s12   ;;  %p1737_p6 = scmp.ne.s32.totalorder %s1726_s24, 0 }
 0x626   : > { %p1738_p12 = scmp.ge.s32.totalorder %s1389_s15, 2  ;;  %s963_s19 = scalar_lea.sflag [#allocation4], %s962_s30 }
 0x628   : > { %p1168_p0 = pnand %p1738_p12, %p1737_p6 }
 0x62a   : > { %1372 = dma.done.wait (!%p1168_p0), %s963_s19, 128  }
 0x62b   : > { %1374 = vsyncadd (!%p1168_p0), %s963_s19, 4294967168  ;;  %p19_p8 = scmp.ge.s32.totalorder %s1448_s18, 4   ;;  %s1739_s12 = smov %s1381_s13 }
 0x62c   : > { %s1740_s13 = smov %s1385_s14  ;;  %s1741_s14 = smov %s1460_s21 }
 0x62d   : > { %s1742_s15 = smov %s1448_s18  ;;  %21 = sbr.rel (!%p19_p8) target bundleno = 9 (0x9), region = 101 }
 0x634   :  { %968 = vsyncpa [#allocation3], 1 }
 0x635   :  { %970 = vsyncpa [#allocation3 + $0x1], 1 }
 0x636   :  { %971 = vsyncpa [#allocation6], 1 }
 0x637   :  { %973 = vsyncpa [#allocation6 + $0x1], 1 }
 0x638   :  { %974 = vsyncpa [#allocation4], 1 }
 0x639   :  { %976 = vsyncpa [#allocation4 + $0x1], 1 }

</bundles_post_ra>
